<compile_context>
chip_gen: v7x
topology: tpu7x:2x2x1
jax: 0.10.0
libtpu: 0.0.40
codegen_flags: <defaults>
</compile_context>

<pallas_src>
import jax
import jax.numpy as jnp
from jax.experimental import pallas as pl
from jax.experimental.pallas import tpu as pltpu

MXU_DTYPE = jnp.bfloat16   # MXU operand dtype (accumulation stays f32)
MID_OFF = 16               # bf16 sublane-tile aligned start of the scratch interior


def resblock_kernel(xpad_ref, w1_ref, b1_ref, w2_ref, b2_ref, o_ref, mid_ref):
    """One batch block per grid step.

    xpad_ref : (NB, H+2, W*C) f32   H-halo-padded input, W*C folded on lanes
    w1_ref   : (3, W*C, W*C) bf16   conv1 banded weights (one matrix per dy tap)
    b1_ref   : (1, W*C)      f32    conv1 bias, tiled over W
    w2_ref   : (3, W*C, W*C) bf16   conv2 banded weights
    b2_ref   : (1, W*C)      f32    conv2 bias, tiled over W
    o_ref    : (NB, H, W*C)         output
    mid_ref  : (NB, MID_OFF+H+1, W*C) bf16 scratch; rows MID_OFF-1 / MID_OFF+H
               are the zero H-halo, rows MID_OFF..MID_OFF+H-1 hold ReLU(conv1).
    """
    NB, Hp, WC = xpad_ref.shape
    H = Hp - 2
    M = NB * H

    # ---- conv1: 3 dense matmuls (dy taps); dx taps + W padding are inside w1 ----
    # Read each tap window directly from the ref (offset vlds, no materialized slab).
    x0 = xpad_ref[:, 0:H, :].reshape(M, WC)
    x1 = xpad_ref[:, 1:H + 1, :].reshape(M, WC)      # center rows == residual input (f32)
    x2 = xpad_ref[:, 2:H + 2, :].reshape(M, WC)
    acc = jnp.dot(x0.astype(MXU_DTYPE), w1_ref[0], preferred_element_type=jnp.float32)
    acc += jnp.dot(x1.astype(MXU_DTYPE), w1_ref[1], preferred_element_type=jnp.float32)
    acc += jnp.dot(x2.astype(MXU_DTYPE), w1_ref[2], preferred_element_type=jnp.float32)
    h = jnp.maximum(acc + b1_ref[...], 0.0)           # bias + ReLU in f32 (VPU)

    # ---- stage ReLU(conv1) into the H-halo scratch ----
    # Interior starts at a tile-aligned row -> full, unmasked store.  Only the
    # two halo rows are rewritten each step (they are never touched otherwise).
    h_lo = h.astype(MXU_DTYPE)
    mid_ref[:, MID_OFF - 1:MID_OFF, :] = jnp.zeros((NB, 1, WC), MXU_DTYPE)          # top halo
    mid_ref[:, MID_OFF + H:MID_OFF + H + 1, :] = jnp.zeros((NB, 1, WC), MXU_DTYPE)  # bottom halo
    mid_ref[:, MID_OFF:MID_OFF + H, :] = h_lo.reshape(NB, H, WC)

    # ---- conv2: tap windows read straight from the scratch ref ----
    m0 = mid_ref[:, MID_OFF - 1:MID_OFF - 1 + H, :].reshape(M, WC)
    m2 = mid_ref[:, MID_OFF + 1:MID_OFF + 1 + H, :].reshape(M, WC)
    acc2 = jnp.dot(m0, w2_ref[0], preferred_element_type=jnp.float32)
    acc2 += jnp.dot(h_lo, w2_ref[1], preferred_element_type=jnp.float32)  # center tap: reuse value
    acc2 += jnp.dot(m2, w2_ref[2], preferred_element_type=jnp.float32)

    # ---- bias + residual add (f32), lane-dense store ----
    out = acc2 + b2_ref[...] + x1
    o_ref[...] = out.reshape(NB, H, WC).astype(o_ref.dtype)


def _banded_weights(w_oihw, width):
    """OIHW (Co, Ci, 3, 3) -> (3, width*Ci, width*Co) block-banded bf16 matrices.

    A[dy][wx*Ci + ci, w*Co + co] = K[dy, wx - w + 1, ci, co] when the horizontal
    tap index dx = wx - w + 1 is in [0, 3), else 0.  This folds the dx taps and
    the SAME padding along W into a single matmul per vertical tap dy.
    """
    k = jnp.transpose(w_oihw, (2, 3, 1, 0)).astype(jnp.float32)   # (3, 3, Ci, Co)
    _, _, ci, co = k.shape
    wx = jnp.arange(width)[:, None]
    wo = jnp.arange(width)[None, :]
    dx = wx - wo + 1                                              # (W, W)
    valid = (dx >= 0) & (dx <= 2)
    a = k[:, jnp.clip(dx, 0, 2), :, :]                            # (3, W, W, Ci, Co)
    a = jnp.where(valid[None, :, :, None, None], a, 0.0)
    a = jnp.transpose(a, (0, 1, 3, 2, 4)).reshape(3, width * ci, width * co)
    return a.astype(MXU_DTYPE)


@jax.jit
def resblock_forward(x_nchw, w1, b1, w2, b2):
    """PyTorch-equivalent ResBlock.forward.  x: (N, C, H, W); w: (C, C, 3, 3)."""
    N, C, H, W = x_nchw.shape
    WC = W * C

    # Layout glue (XLA, outside the kernel): NCHW -> (N, H, W*C) + 1-row H halo.
    x_fold = jnp.transpose(x_nchw, (0, 2, 3, 1)).reshape(N, H, WC)
    xpad = jnp.pad(x_fold, ((0, 0), (1, 1), (0, 0)))

    w1b = _banded_weights(w1, W)
    w2b = _banded_weights(w2, W)
    b1f = jnp.tile(b1, W).reshape(1, WC).astype(jnp.float32)
    b2f = jnp.tile(b2, W).reshape(1, WC).astype(jnp.float32)

    # Batch blocking: fold NB images into the matmul M dim per grid step while
    # keeping >= 2 "parallel" grid steps when possible (v7x has 2 TensorCores).
    nb = max(1, N // 2)
    if N % nb != 0:
        nb = 1
    grid = (N // nb,)

    out_fold = pl.pallas_call(
        resblock_kernel,
        out_shape=jax.ShapeDtypeStruct((N, H, WC), x_nchw.dtype),
        grid=grid,
        in_specs=[
            pl.BlockSpec((nb, H + 2, WC), lambda i: (i, 0, 0)),
            pl.BlockSpec((3, WC, WC), lambda i: (0, 0, 0)),
            pl.BlockSpec((1, WC), lambda i: (0, 0)),
            pl.BlockSpec((3, WC, WC), lambda i: (0, 0, 0)),
            pl.BlockSpec((1, WC), lambda i: (0, 0)),
        ],
        out_specs=pl.BlockSpec((nb, H, WC), lambda i: (i, 0, 0)),
        scratch_shapes=[pltpu.VMEM((nb, MID_OFF + H + 1, WC), MXU_DTYPE)],
        compiler_params=pltpu.CompilerParams(
            dimension_semantics=("parallel",),
            # Per-step footprint is tiny (<1 MiB incl. double buffering); keep
            # an explicit limit that is safe on v5e/v6e (128 MiB) and v7x (64 MiB).
            vmem_limit_bytes=32 * 1024 * 1024,
        ),
    )(xpad, w1b, b1f, w2b, b2f)

    # (N, H, W*C) -> NCHW
    return jnp.transpose(out_fold.reshape(N, H, W, C), (0, 3, 1, 2))


def ref_forward(x, w1, b1, w2, b2):
    """Pure-JAX reference with matched bf16 MXU operands / f32 accumulation."""
    dn = ("NCHW", "OIHW", "NCHW")
    y = jax.lax.conv_general_dilated(
        x.astype(MXU_DTYPE), w1.astype(MXU_DTYPE), (1, 1), "SAME",
        dimension_numbers=dn, preferred_element_type=jnp.float32)
    y = jnp.maximum(y + b1.reshape(1, -1, 1, 1), 0.0)
    y = jax.lax.conv_general_dilated(
        y.astype(MXU_DTYPE), w2.astype(MXU_DTYPE), (1, 1), "SAME",
        dimension_numbers=dn, preferred_element_type=jnp.float32)
    y = y + b2.reshape(1, -1, 1, 1)
    return y + x


if __name__ == "__main__":
    # Small deterministic setup: nFeat=8, batch=2, spatial=16 (W*C = 128 -> lane-dense).
    N, C, H, W = 2, 8, 16, 16
    key = jax.random.PRNGKey(0)
    kx, kw1, kb1, kw2, kb2 = jax.random.split(key, 5)

    fan_in = C * 3 * 3
    bound = 1.0 / (fan_in ** 0.5)  # matches torch Conv2d default init scale

    x = jax.random.normal(kx, (N, C, H, W), jnp.float32)
    w1 = jax.random.uniform(kw1, (C, C, 3, 3), jnp.float32, -bound, bound)
    b1 = jax.random.uniform(kb1, (C,), jnp.float32, -bound, bound)
    w2 = jax.random.uniform(kw2, (C, C, 3, 3), jnp.float32, -bound, bound)
    b2 = jax.random.uniform(kb2, (C,), jnp.float32, -bound, bound)

    out = resblock_forward(x, w1, b1, w2, b2)
    out = jax.block_until_ready(out)

    ref = ref_forward(x, w1, b1, w2, b2)
    assert out.shape == (N, C, H, W)
    assert jnp.allclose(out, ref, atol=2e-3, rtol=2e-3), "Pallas output mismatch vs reference"

    print("KERNEL_OK")
</pallas_src>

<mosaic_0001>
module attributes {stable_mosaic.version = 11 : i64} {
  func.func @resblock_kernel(%arg0: i32, %arg1: memref<1x18x128xf32, #tpu.memory_space<vmem>>, %arg2: memref<3x128x128xbf16, #tpu.memory_space<vmem>>, %arg3: memref<1x128xf32, #tpu.memory_space<vmem>>, %arg4: memref<3x128x128xbf16, #tpu.memory_space<vmem>>, %arg5: memref<1x128xf32, #tpu.memory_space<vmem>>, %arg6: memref<1x16x128xf32, #tpu.memory_space<vmem>>, %arg7: memref<1x33x128xbf16, #tpu.memory_space<vmem>>) attributes {dimension_semantics = [#tpu.dimension_semantics<parallel>], iteration_bounds = array<i64: 2>, scalar_prefetch = 0 : i64, scratch_operands = 1 : i64, tpu.core_type = #tpu.core_type<tc>, window_params = [{transform_indices = @transform_0, window_bounds = array<i64: 1, 18, 128>}, {pipeline_mode = #tpu.pipeline_mode<synchronous>, transform_indices = @transform_1, window_bounds = array<i64: 3, 128, 128>}, {pipeline_mode = #tpu.pipeline_mode<synchronous>, transform_indices = @transform_2, window_bounds = array<i64: 1, 128>}, {pipeline_mode = #tpu.pipeline_mode<synchronous>, transform_indices = @transform_3, window_bounds = array<i64: 3, 128, 128>}, {pipeline_mode = #tpu.pipeline_mode<synchronous>, transform_indices = @transform_4, window_bounds = array<i64: 1, 128>}, {transform_indices = @transform_5, window_bounds = array<i64: 1, 16, 128>}]} {
    %c0 = arith.constant 0 : index
    %c0_0 = arith.constant 0 : index
    %c0_1 = arith.constant 0 : index
    %0 = vector.load %arg1[%c0, %c0_0, %c0_1] : memref<1x18x128xf32, #tpu.memory_space<vmem>>, vector<1x16x128xf32>
    %1 = vector.shape_cast %0 : vector<1x16x128xf32> to vector<16x128xf32>
    %c0_2 = arith.constant 0 : index
    %c1 = arith.constant 1 : index
    %c0_3 = arith.constant 0 : index
    %2 = vector.load %arg1[%c0_2, %c1, %c0_3] : memref<1x18x128xf32, #tpu.memory_space<vmem>>, vector<1x16x128xf32>
    %3 = vector.shape_cast %2 : vector<1x16x128xf32> to vector<16x128xf32>
    %c0_4 = arith.constant 0 : index
    %c2 = arith.constant 2 : index
    %c0_5 = arith.constant 0 : index
    %4 = vector.load %arg1[%c0_4, %c2, %c0_5] : memref<1x18x128xf32, #tpu.memory_space<vmem>>, vector<1x16x128xf32>
    %5 = vector.shape_cast %4 : vector<1x16x128xf32> to vector<16x128xf32>
    %6 = arith.truncf %1 : vector<16x128xf32> to vector<16x128xbf16>
    %c0_6 = arith.constant 0 : index
    %c0_7 = arith.constant 0 : index
    %c0_8 = arith.constant 0 : index
    %7 = vector.load %arg2[%c0_6, %c0_7, %c0_8] : memref<3x128x128xbf16, #tpu.memory_space<vmem>>, vector<1x128x128xbf16>
    %8 = vector.shape_cast %7 : vector<1x128x128xbf16> to vector<128x128xbf16>
    %cst = arith.constant dense<0.000000e+00> : vector<16x128xf32>
    %9 = tpu.matmul %6, %8, %cst {dimension_numbers = #tpu.dot_dimension_numbers<[1], [0], [0], [1], [0, 0, 1, 1], [], []>} : vector<16x128xbf16>, vector<128x128xbf16>, vector<16x128xf32> -> vector<16x128xf32>
    %10 = arith.truncf %3 : vector<16x128xf32> to vector<16x128xbf16>
    %c1_9 = arith.constant 1 : index
    %c0_10 = arith.constant 0 : index
    %c0_11 = arith.constant 0 : index
    %11 = vector.load %arg2[%c1_9, %c0_10, %c0_11] : memref<3x128x128xbf16, #tpu.memory_space<vmem>>, vector<1x128x128xbf16>
    %12 = vector.shape_cast %11 : vector<1x128x128xbf16> to vector<128x128xbf16>
    %cst_12 = arith.constant dense<0.000000e+00> : vector<16x128xf32>
    %13 = tpu.matmul %10, %12, %cst_12 {dimension_numbers = #tpu.dot_dimension_numbers<[1], [0], [0], [1], [0, 0, 1, 1], [], []>} : vector<16x128xbf16>, vector<128x128xbf16>, vector<16x128xf32> -> vector<16x128xf32>
    %14 = arith.addf %9, %13 : vector<16x128xf32>
    %15 = arith.truncf %5 : vector<16x128xf32> to vector<16x128xbf16>
    %c2_13 = arith.constant 2 : index
    %c0_14 = arith.constant 0 : index
    %c0_15 = arith.constant 0 : index
    %16 = vector.load %arg2[%c2_13, %c0_14, %c0_15] : memref<3x128x128xbf16, #tpu.memory_space<vmem>>, vector<1x128x128xbf16>
    %17 = vector.shape_cast %16 : vector<1x128x128xbf16> to vector<128x128xbf16>
    %cst_16 = arith.constant dense<0.000000e+00> : vector<16x128xf32>
    %18 = tpu.matmul %15, %17, %cst_16 {dimension_numbers = #tpu.dot_dimension_numbers<[1], [0], [0], [1], [0, 0, 1, 1], [], []>} : vector<16x128xbf16>, vector<128x128xbf16>, vector<16x128xf32> -> vector<16x128xf32>
    %19 = arith.addf %14, %18 : vector<16x128xf32>
    %c0_17 = arith.constant 0 : index
    %c0_18 = arith.constant 0 : index
    %20 = vector.load %arg3[%c0_17, %c0_18] : memref<1x128xf32, #tpu.memory_space<vmem>>, vector<1x128xf32>
    %21 = vector.broadcast %20 : vector<1x128xf32> to vector<16x128xf32>
    %22 = arith.addf %19, %21 : vector<16x128xf32>
    %cst_19 = arith.constant 0.000000e+00 : f32
    %23 = vector.broadcast %cst_19 : f32 to vector<16x128xf32>
    %24 = arith.maximumf %22, %23 : vector<16x128xf32>
    %25 = arith.truncf %24 : vector<16x128xf32> to vector<16x128xbf16>
    %cst_20 = arith.constant 0.000000e+00 : bf16
    %26 = vector.broadcast %cst_20 : bf16 to vector<1x1x128xbf16>
    %c0_21 = arith.constant 0 : index
    %c15 = arith.constant 15 : index
    %c0_22 = arith.constant 0 : index
    %27 = vector.load %arg7[%c0_21, %c15, %c0_22] : memref<1x33x128xbf16, #tpu.memory_space<vmem>>, vector<1x1x128xbf16>
    tpu.vector_store %arg7[%c0_21, %c15, %c0_22], %26 {strides = array<i32>} : memref<1x33x128xbf16, #tpu.memory_space<vmem>>, vector<1x1x128xbf16>,
    %cst_23 = arith.constant 0.000000e+00 : bf16
    %28 = vector.broadcast %cst_23 : bf16 to vector<1x1x128xbf16>
    %c0_24 = arith.constant 0 : index
    %c32 = arith.constant 32 : index
    %c0_25 = arith.constant 0 : index
    %29 = vector.load %arg7[%c0_24, %c32, %c0_25] : memref<1x33x128xbf16, #tpu.memory_space<vmem>>, vector<1x1x128xbf16>
    tpu.vector_store %arg7[%c0_24, %c32, %c0_25], %28 {strides = array<i32>} : memref<1x33x128xbf16, #tpu.memory_space<vmem>>, vector<1x1x128xbf16>,
    %30 = vector.shape_cast %25 : vector<16x128xbf16> to vector<1x16x128xbf16>
    %c0_26 = arith.constant 0 : index
    %c16 = arith.constant 16 : index
    %c0_27 = arith.constant 0 : index
    %31 = vector.load %arg7[%c0_26, %c16, %c0_27] : memref<1x33x128xbf16, #tpu.memory_space<vmem>>, vector<1x16x128xbf16>
    tpu.vector_store %arg7[%c0_26, %c16, %c0_27], %30 {strides = array<i32>} : memref<1x33x128xbf16, #tpu.memory_space<vmem>>, vector<1x16x128xbf16>,
    %c0_28 = arith.constant 0 : index
    %c15_29 = arith.constant 15 : index
    %c0_30 = arith.constant 0 : index
    %32 = vector.load %arg7[%c0_28, %c15_29, %c0_30] : memref<1x33x128xbf16, #tpu.memory_space<vmem>>, vector<1x16x128xbf16>
    %33 = vector.shape_cast %32 : vector<1x16x128xbf16> to vector<16x128xbf16>
    %c0_31 = arith.constant 0 : index
    %c17 = arith.constant 17 : index
    %c0_32 = arith.constant 0 : index
    %34 = vector.load %arg7[%c0_31, %c17, %c0_32] : memref<1x33x128xbf16, #tpu.memory_space<vmem>>, vector<1x16x128xbf16>
    %35 = vector.shape_cast %34 : vector<1x16x128xbf16> to vector<16x128xbf16>
    %c0_33 = arith.constant 0 : index
    %c0_34 = arith.constant 0 : index
    %c0_35 = arith.constant 0 : index
    %36 = vector.load %arg4[%c0_33, %c0_34, %c0_35] : memref<3x128x128xbf16, #tpu.memory_space<vmem>>, vector<1x128x128xbf16>
    %37 = vector.shape_cast %36 : vector<1x128x128xbf16> to vector<128x128xbf16>
    %cst_36 = arith.constant dense<0.000000e+00> : vector<16x128xf32>
    %38 = tpu.matmul %33, %37, %cst_36 {dimension_numbers = #tpu.dot_dimension_numbers<[1], [0], [0], [1], [0, 0, 1, 1], [], []>} : vector<16x128xbf16>, vector<128x128xbf16>, vector<16x128xf32> -> vector<16x128xf32>
    %c1_37 = arith.constant 1 : index
    %c0_38 = arith.constant 0 : index
    %c0_39 = arith.constant 0 : index
    %39 = vector.load %arg4[%c1_37, %c0_38, %c0_39] : memref<3x128x128xbf16, #tpu.memory_space<vmem>>, vector<1x128x128xbf16>
    %40 = vector.shape_cast %39 : vector<1x128x128xbf16> to vector<128x128xbf16>
    %cst_40 = arith.constant dense<0.000000e+00> : vector<16x128xf32>
    %41 = tpu.matmul %25, %40, %cst_40 {dimension_numbers = #tpu.dot_dimension_numbers<[1], [0], [0], [1], [0, 0, 1, 1], [], []>} : vector<16x128xbf16>, vector<128x128xbf16>, vector<16x128xf32> -> vector<16x128xf32>
    %42 = arith.addf %38, %41 : vector<16x128xf32>
    %c2_41 = arith.constant 2 : index
    %c0_42 = arith.constant 0 : index
    %c0_43 = arith.constant 0 : index
    %43 = vector.load %arg4[%c2_41, %c0_42, %c0_43] : memref<3x128x128xbf16, #tpu.memory_space<vmem>>, vector<1x128x128xbf16>
    %44 = vector.shape_cast %43 : vector<1x128x128xbf16> to vector<128x128xbf16>
    %cst_44 = arith.constant dense<0.000000e+00> : vector<16x128xf32>
    %45 = tpu.matmul %35, %44, %cst_44 {dimension_numbers = #tpu.dot_dimension_numbers<[1], [0], [0], [1], [0, 0, 1, 1], [], []>} : vector<16x128xbf16>, vector<128x128xbf16>, vector<16x128xf32> -> vector<16x128xf32>
    %46 = arith.addf %42, %45 : vector<16x128xf32>
    %c0_45 = arith.constant 0 : index
    %c0_46 = arith.constant 0 : index
    %47 = vector.load %arg5[%c0_45, %c0_46] : memref<1x128xf32, #tpu.memory_space<vmem>>, vector<1x128xf32>
    %48 = vector.broadcast %47 : vector<1x128xf32> to vector<16x128xf32>
    %49 = arith.addf %46, %48 : vector<16x128xf32>
    %50 = arith.addf %49, %3 : vector<16x128xf32>
    %51 = vector.shape_cast %50 : vector<16x128xf32> to vector<1x16x128xf32>
    %c0_47 = arith.constant 0 : index
    %c0_48 = arith.constant 0 : index
    %c0_49 = arith.constant 0 : index
    %52 = vector.load %arg6[%c0_47, %c0_48, %c0_49] : memref<1x16x128xf32, #tpu.memory_space<vmem>>, vector<1x16x128xf32>
    tpu.vector_store %arg6[%c0_47, %c0_48, %c0_49], %51 {strides = array<i32>} : memref<1x16x128xf32, #tpu.memory_space<vmem>>, vector<1x16x128xf32>,
    return
  }
  func.func @transform_0(%arg0: i32) -> (i32, i32, i32) {
    %c0_i32 = arith.constant 0 : i32
    %c0_i32_0 = arith.constant 0 : i32
    %c0_i32_1 = arith.constant 0 : i32
    return %arg0, %c0_i32, %c0_i32_0 : i32, i32, i32
  }
  func.func @transform_1(%arg0: i32) -> (i32, i32, i32) {
    %c0_i32 = arith.constant 0 : i32
    %c0_i32_0 = arith.constant 0 : i32
    %c0_i32_1 = arith.constant 0 : i32
    %c0_i32_2 = arith.constant 0 : i32
    return %c0_i32, %c0_i32_0, %c0_i32_1 : i32, i32, i32
  }
  func.func @transform_2(%arg0: i32) -> (i32, i32) {
    %c0_i32 = arith.constant 0 : i32
    %c0_i32_0 = arith.constant 0 : i32
    %c0_i32_1 = arith.constant 0 : i32
    return %c0_i32, %c0_i32_0 : i32, i32
  }
  func.func @transform_3(%arg0: i32) -> (i32, i32, i32) {
    %c0_i32 = arith.constant 0 : i32
    %c0_i32_0 = arith.constant 0 : i32
    %c0_i32_1 = arith.constant 0 : i32
    %c0_i32_2 = arith.constant 0 : i32
    return %c0_i32, %c0_i32_0, %c0_i32_1 : i32, i32, i32
  }
  func.func @transform_4(%arg0: i32) -> (i32, i32) {
    %c0_i32 = arith.constant 0 : i32
    %c0_i32_0 = arith.constant 0 : i32
    %c0_i32_1 = arith.constant 0 : i32
    return %c0_i32, %c0_i32_0 : i32, i32
  }
  func.func @transform_5(%arg0: i32) -> (i32, i32, i32) {
    %c0_i32 = arith.constant 0 : i32
    %c0_i32_0 = arith.constant 0 : i32
    %c0_i32_1 = arith.constant 0 : i32
    return %arg0, %c0_i32, %c0_i32_0 : i32, i32, i32
  }
}

</mosaic_0001>

<bundles_post_ra>
// kernel: tile.13
= control target key start
LH: loop header
LB: loop body
LE: loop exit
PB: predicated region body
PF: predicated region fallthrough
CT: control target
= control target key end

     0   :  { %s28_s0 = inlined_call_operand.vmem [shape: f32[8], index: 0, kind: input, shape index: {}]   ;;  %s29_s1 = inlined_call_operand.vmem [shape: f32[16,8], index: 1, kind: output, shape index: {}]  }
   0x1   :  { %v4_v0 = vld [vmem:[%s28_s0] ss:$0 sm:$0xff] }
   0x2   :  { %5 = vst [vmem:[%s29_s1] sm:$0xff] %v4_v0  ;;  %8 = vst [vmem:[%s29_s1 + $0x8] sm:$0xff] %v4_v0 }

// kernel: tile.14
= control target key start
LH: loop header
LB: loop body
LE: loop exit
PB: predicated region body
PF: predicated region fallthrough
CT: control target
= control target key end

     0   :  { %s131_s10 = smov 120   ;;  %s132_s11 = smov 104   ;;  %vm3_vm0 = vcmask 64512   ;;  %vm9_vm1 = vcmask 1048512   ;;  %vm15_vm2 = vcmask 982912   ;;  %vm21_vm3 = vcmask 917312   ;;  %s207_s0 = inlined_call_operand.vmem [shape: f32[16,8], index: 0, kind: input, shape index: {}]   ;;  %s208_s1 = inlined_call_operand.vmem [shape: f32[1,128], index: 1, kind: output, shape index: {}]  }
   0x1   :  { %v101_v0 = vld [vmem:[%s207_s0 + $0xf] sm:$0x1]   ;;  %v103_v1 = vld [vmem:[%s207_s0 + $0xd] sm:$0x1]   ;;  %v102_v2 = vld [vmem:[%s207_s0 + $0xe] sm:$0x1]  }
   0x2   :  { %7 = vrot.lane.b32.xlu0 %v101_v0, %s131_s10  ;;  %19 = vrot.lane.b32.xlu1 %v103_v1, %s132_s11  ;;  %v104_v3 = vld [vmem:[%s207_s0 + $0xc] sm:$0x1]   ;;  %s133_s16 = smov 112   ;;  %s134_s17 = smov 96   ;;  %v105_v4 = vld [vmem:[%s207_s0 + $0xb] sm:$0x1]  }
   0x3   :  { %v106_v5 = vld [vmem:[%s207_s0 + $0xa] sm:$0x1]   ;;  %v2_v6 = vld [vmem:[%s207_s0] sm:$0x1]   ;;  %s135_s24 = smov 88   ;;  %s136_s25 = smov 80  }
   0x4   :  { %4 = vst.msk [vmem:[#allocation0] sm:$0x1] %vm3_vm0, %v2_v6   ;;  %v107_v7 = vld [vmem:[%s207_s0 + $0x9] sm:$0x1]   ;;  %v108_v8 = vld [vmem:[%s207_s0 + $0x8] sm:$0x1]  }
   0x5   :  { %s137_s30 = smov 72   ;;  %s138_s2 = smov 64   ;;  %v109_v9 = vld [vmem:[%s207_s0 + $0x7] sm:$0x1]   ;;  %v110_v10 = vld [vmem:[%s207_s0 + $0x6] sm:$0x1]  }
   0x6   :  { %13 = vrot.lane.b32.xlu0 %v102_v2, %s133_s16  ;;  %25 = vrot.lane.b32.xlu1 %v104_v3, %s134_s17  ;;  %s139_s7 = smov 56   ;;  %s140_s8 = smov 48   ;;  %v111_v11 = vld [vmem:[%s207_s0 + $0x5] sm:$0x1]   ;;  %v112_v12 = vld [vmem:[%s207_s0 + $0x4] sm:$0x1]  }
   0x7   :  { %s141_s13 = smov 40   ;;  %s142_s14 = smov 32   ;;  %v113_v13 = vld [vmem:[%s207_s0 + $0x3] sm:$0x1]   ;;  %v114_v14 = vld [vmem:[%s207_s0 + $0x2] sm:$0x1]  }
   0x8   :  { %s143_s19 = smov 24   ;;  %s144_s20 = smov 16   ;;  %v115_v15 = vld [vmem:[%s207_s0 + $0x1] sm:$0x1]   ;;  %vm27_vm4 = vcmask 851712   ;;  %vm33_vm5 = vcmask 786112  }
   0x9   :  { %s145_s0 = smov 8   ;;  %vm39_vm6 = vcmask 720512   ;;  %vm45_vm7 = vcmask 654912   ;;  %vm51_vm8 = vcmask 589312   ;;  %vm57_vm9 = vcmask 523712  }
   0xa   :  { %31 = vrot.lane.b32.xlu0 %v105_v4, %s135_s24  ;;  %37 = vrot.lane.b32.xlu1 %v106_v5, %s136_s25  ;;  %vm63_vm10 = vcmask 458112   ;;  %vm69_vm11 = vcmask 392512   ;;  %vm75_vm12 = vcmask 326912   ;;  %vm81_vm13 = vcmask 261312  }
   0xb   :  { %vm87_vm14 = vcmask 195712   ;;  %vm93_vm15 = vcmask 130112  }
   0xe   :  { %43 = vrot.lane.b32.xlu0 %v107_v7, %s137_s30  ;;  %49 = vrot.lane.b32.xlu1 %v108_v8, %s138_s2 }
  0x12   :  { %55 = vrot.lane.b32.xlu0 %v109_v9, %s139_s7  ;;  %61 = vrot.lane.b32.xlu1 %v110_v10, %s140_s8 }
  0x16   :  { %67 = vrot.lane.b32.xlu0 %v111_v11, %s141_s13  ;;  %73 = vrot.lane.b32.xlu1 %v112_v12, %s142_s14 }
  0x1a   :  { %79 = vrot.lane.b32.xlu0 %v113_v13, %s143_s19  ;;  %85 = vrot.lane.b32.xlu1 %v114_v14, %s144_s20 }
  0x1e   :  { %91 = vrot.lane.b32.xlu0 %v115_v15, %s145_s0 }
  0x74   :  { %v8_v16 = vpop.permute.xlu0 %7   ;;  %v20_v17 = vpop.permute.xlu1 %19  }
  0x75   :  { %10 = vst.msk [vmem:[#allocation0] sm:$0x1] %vm9_vm1, %v8_v16  }
  0x78   :  { %v14_v18 = vpop.permute.xlu0 %13   ;;  %v26_v19 = vpop.permute.xlu1 %25  }
  0x79   :  { %16 = vst.msk [vmem:[#allocation0] sm:$0x1] %vm15_vm2, %v14_v18  }
  0x7a   :  { %22 = vst.msk [vmem:[#allocation0] sm:$0x1] %vm21_vm3, %v20_v17  }
  0x7b   :  { %28 = vst.msk [vmem:[#allocation0] sm:$0x1] %vm27_vm4, %v26_v19  }
  0x7c   :  { %v32_v20 = vpop.permute.xlu0 %31   ;;  %v38_v21 = vpop.permute.xlu1 %37  }
  0x7d   :  { %34 = vst.msk [vmem:[#allocation0] sm:$0x1] %vm33_vm5, %v32_v20  }
  0x7e   :  { %40 = vst.msk [vmem:[#allocation0] sm:$0x1] %vm39_vm6, %v38_v21  }
  0x80   :  { %v44_v22 = vpop.permute.xlu0 %43   ;;  %v50_v23 = vpop.permute.xlu1 %49  }
  0x81   :  { %46 = vst.msk [vmem:[#allocation0] sm:$0x1] %vm45_vm7, %v44_v22  }
  0x82   :  { %52 = vst.msk [vmem:[#allocation0] sm:$0x1] %vm51_vm8, %v50_v23  }
  0x84   :  { %v56_v24 = vpop.permute.xlu0 %55   ;;  %v62_v25 = vpop.permute.xlu1 %61  }
  0x85   :  { %58 = vst.msk [vmem:[#allocation0] sm:$0x1] %vm57_vm9, %v56_v24  }
  0x86   :  { %64 = vst.msk [vmem:[#allocation0] sm:$0x1] %vm63_vm10, %v62_v25  }
  0x88   :  { %v68_v26 = vpop.permute.xlu0 %67   ;;  %v74_v27 = vpop.permute.xlu1 %73  }
  0x89   :  { %70 = vst.msk [vmem:[#allocation0] sm:$0x1] %vm69_vm11, %v68_v26  }
  0x8a   :  { %76 = vst.msk [vmem:[#allocation0] sm:$0x1] %vm75_vm12, %v74_v27  }
  0x8c   :  { %v80_v28 = vpop.permute.xlu0 %79   ;;  %v86_v29 = vpop.permute.xlu1 %85  }
  0x8d   :  { %82 = vst.msk [vmem:[#allocation0] sm:$0x1] %vm81_vm13, %v80_v28  }
  0x8e   :  { %88 = vst.msk [vmem:[#allocation0] sm:$0x1] %vm87_vm14, %v86_v29  }
  0x90   :  { %v92_v30 = vpop.permute.xlu0 %91  }
  0x91   :  { %94 = vst.msk [vmem:[#allocation0] sm:$0x1] %vm93_vm15, %v92_v30  }
  0x98   :  { %v98_v31 = vld [vmem:[#allocation0] sm:$0x1] }
  0x99   :  { %100 = vst [vmem:[%s208_s1] sm:$0x1] %v98_v31 }

// kernel: resblock_forward.1
= control target key start
LH: loop header
LB: loop body
LE: loop exit
PB: predicated region body
PF: predicated region fallthrough
CT: control target
= control target key end

     0   :  { %s1439_s18 = smov 0   ;;  %s1690_s0 = inlined_call_operand.vmem [shape: f32[2,18,128], index: 0, kind: input, shape index: {}]   ;;  %s1691_s1 = inlined_call_operand.vmem [shape: bf16[3,128,128], index: 1, kind: input, shape index: {}]   ;;  %s1692_s2 = inlined_call_operand.vmem [shape: f32[1,128], index: 2, kind: input, shape index: {}]   ;;  %s1693_s3 = inlined_call_operand.vmem [shape: bf16[3,128,128], index: 3, kind: input, shape index: {}]   ;;  %s1694_s4 = inlined_call_operand.vmem [shape: f32[1,128], index: 4, kind: input, shape index: {}]   ;;  %s1695_s5 = inlined_call_operand.vmem [shape: f32[2,16,128], index: 5, kind: output, shape index: {}]  }
   0x1 LB: > { %s1023_s19 = sadd.s32 4294967295, %s1405_s18   ;;  %p1027_p0 = scmp.ge.s32.totalorder %s1405_s18, 1  ;;  %s1405_s18 = sphi %s1439_s18, %s15_s18  }
   0x2   : > { %p187_p1 = scmp.lt.s32.totalorder %s1405_s18, 3 }
   0x4   : > { %p188_p2 = pnand %p1027_p0, %p187_p1 }
   0x5   : > { %v1347_v0 = vld [vmem:[%s1691_s1 + $0x40] sm:$0xff] (!%p188_p2)   ;;  %v1407_v1 = vmov (!%p188_p2), 0.0   ;;  %v1349_v3 = vld [vmem:[%s1691_s1 + $0x48] sm:$0xff] (!%p188_p2)   ;;  %vm1408_vm0 = vmmov (!%p188_p2), 0   ;;  %v1351_v5 = vld [vmem:[%s1691_s1 + $0x50] sm:$0xff] (!%p188_p2)   ;;  %p215_p3 = scmp.lt.s32.totalorder (!%p188_p2), %s1023_s19, 1 }
   0x6   : > { %191 = sbr.rel (%p188_p2) target bundleno = 545 (0x221), region = 40  ;;  %1216 = vmatprep.subr.bf16.mxu0 (!%p188_p2), %v1407_v1  ;;  %1236 = vmatprep.subr.bf16.mxu1 (!%p188_p2), %v1407_v1  ;;  %v1348_v2 = vld [vmem:[%s1691_s1] sm:$0xff] (!%p188_p2)   ;;  %v1350_v4 = vld [vmem:[%s1691_s1 + $0x8] sm:$0xff] (!%p188_p2)   ;;  %v1352_v6 = vld [vmem:[%s1691_s1 + $0x10] sm:$0xff] (!%p188_p2)   ;;  %vm566_vm1 = vcmask (!%p188_p2), 1043459   ;;  %vm572_vm4 = vcmask (!%p188_p2), 1040384  }
   0x7   : > { %1217 = vmatpush3.bf16.msra.mxu0 (!%p188_p2), %v1347_v0  ;;  %1232 = vmatprep.mubr.msk.bf16.mxu0 (!%p188_p2), %vm1408_vm0, %v1407_v1  ;;  %v1353_v7 = vld [vmem:[%s1691_s1 + $0x58] sm:$0xff] (!%p188_p2)   ;;  %v1355_v9 = vld [vmem:[%s1691_s1 + $0x60] sm:$0xff] (!%p188_p2)   ;;  %v1357_v11 = vld [vmem:[%s1691_s1 + $0x68] sm:$0xff] (!%p188_p2)   ;;  %vm567_vm2 = vsmask.f32 (!%p188_p2), 7950 }
   0x8   : > { %1237 = vmatpush3.bf16.msra.mxu1 (!%p188_p2), %v1348_v2  ;;  %1218 = vmatprep.subr.bf16.mxu0 (!%p188_p2), %v1407_v1  ;;  %v1354_v8 = vld [vmem:[%s1691_s1 + $0x18] sm:$0xff] (!%p188_p2)   ;;  %v1356_v10 = vld [vmem:[%s1691_s1 + $0x20] sm:$0xff] (!%p188_p2)   ;;  %v1358_v12 = vld [vmem:[%s1691_s1 + $0x28] sm:$0xff] (!%p188_p2)   ;;  %vm573_vm5 = vsmask.f32 (!%p188_p2), 256 }
   0x9   : > { %1238 = vmatprep.subr.bf16.mxu1 (!%p188_p2), %v1407_v1  ;;  %1252 = vmatprep.mubr.msk.bf16.mxu1 (!%p188_p2), %vm1408_vm0, %v1407_v1  ;;  %v1359_v13 = vld [vmem:[%s1691_s1 + $0x70] sm:$0xff] (!%p188_p2)   ;;  %v1361_v15 = vld [vmem:[%s1691_s1 + $0x78] sm:$0xff] (!%p188_p2)   ;;  %v1363_v21 = vld [vmem:[%s1691_s1 + $0x80] sm:$0xff] (!%p188_p2)   ;;  %vm721_vm7 = vsmask.f32 (!%p188_p2), 4352 }
   0xa   : > { %v1360_v14 = vld [vmem:[%s1691_s1 + $0x30] sm:$0xff] (!%p188_p2)   ;;  %v1362_v17 = vld [vmem:[%s1691_s1 + $0x38] sm:$0xff] (!%p188_p2)   ;;  %v1364_v24 = vld [vmem:[%s1691_s1 + $0x88] sm:$0xff] (!%p188_p2)   ;;  %vm850_vm8 = vsmask.f32 (!%p188_p2), 7424 }
   0xb   : > { %1219 = vmatpush3.bf16.msra.mxu0 (!%p188_p2), %v1349_v3  ;;  %v1365_v25 = vld [vmem:[%s1691_s1 + $0x90] sm:$0xff] (!%p188_p2)   ;;  %v1366_v26 = vld [vmem:[%s1691_s1 + $0x98] sm:$0xff] (!%p188_p2)   ;;  %v1367_v27 = vld [vmem:[%s1691_s1 + $0xa0] sm:$0xff] (!%p188_p2)  }
   0xc   : > { %1239 = vmatpush3.bf16.msra.mxu1 (!%p188_p2), %v1350_v4  ;;  %1220 = vmatprep.subr.bf16.mxu0 (!%p188_p2), %v1407_v1  ;;  %v1368_v28 = vld [vmem:[%s1691_s1 + $0xa8] sm:$0xff] (!%p188_p2)   ;;  %v1369_v29 = vld [vmem:[%s1691_s1 + $0xb0] sm:$0xff] (!%p188_p2)   ;;  %v1370_v30 = vld [vmem:[%s1691_s1 + $0xb8] sm:$0xff] (!%p188_p2)  }
   0xd   : > { %1240 = vmatprep.subr.bf16.mxu1 %v1407_v1  ;;  %s1697_s19 = smov (!%p215_p3, %s1023_s19), 1  ;;  %v1371_v34 = vld [vmem:[%s1693_s3 + $0x40] sm:$0xff]   ;;  %v1372_v36 = vld [vmem:[%s1693_s3 + $0x48] sm:$0xff]   ;;  %v1373_v37 = vld [vmem:[%s1693_s3 + $0x50] sm:$0xff]  }
   0xe   : > { %s1336_s15 = smul.u32 24, %s1697_s19  ;;  %v1376_v35 = vld [vmem:[%s1693_s3] sm:$0xff]   ;;  %v1374_v38 = vld [vmem:[%s1693_s3 + $0x58] sm:$0xff]   ;;  %v1377_v40 = vld [vmem:[%s1693_s3 + $0x68] sm:$0xff]   ;;  %s1153_s7 = sshll.u32 %s1697_s19, 4 }
   0xf   : > { %1221 = vmatpush3.bf16.msra.mxu0 %v1351_v5  ;;  %v1375_v39 = vld [vmem:[%s1693_s3 + $0x60] sm:$0xff]   ;;  %v1378_v41 = vld [vmem:[%s1693_s3 + $0x8] sm:$0xff]   ;;  %v1379_v42 = vld [vmem:[%s1693_s3 + $0x70] sm:$0xff]   ;;  %s224_s10 = scalar_lea.vmem %s1695_s5, %s1153_s7 }
  0x10   : > { %1241 = vmatpush3.bf16.msra.mxu1 %v1352_v6  ;;  %1222 = vmatprep.subr.bf16.mxu0 %v1407_v1  ;;  %s1509_s24 = scalar_lea.vmem %s1690_s0, %s1336_s15  ;;  %v1380_v43 = vld [vmem:[%s1693_s3 + $0x10] sm:$0xff]   ;;  %v1381_v44 = vld [vmem:[%s1693_s3 + $0x78] sm:$0xff]   ;;  %vm568_vm3 = vmand %vm566_vm1, %vm567_vm2 }
  0x11   : > { %1242 = vmatprep.subr.bf16.mxu1 %v1407_v1  ;;  %v1523_v16 = vld [vmem:[%s1509_s24 + $0x1] sm:$0xff]  ;;  %v1529_v18 = vld [vmem:[%s1509_s24 + $0x9] sm:$0xff]  ;;  %v1382_v45 = vld [vmem:[%s1693_s3 + $0x18] sm:$0xff]  }
  0x12   : > { %v226_v19 = vld [vmem:[%s1509_s24] sm:$0xff]  ;;  %v227_v20 = vld [vmem:[%s1509_s24 + $0x8] sm:$0xff]  ;;  %v249_v22 = vpack.c.bf16 %v1529_v18, %v1523_v16  ;;  %vm574_vm6 = vmand %vm572_vm4, %vm573_vm5 }
  0x13   : > { %1223 = vmatpush3.bf16.msra.mxu0 %v1353_v7  ;;  %v232_v23 = vpack.c.bf16 %v227_v20, %v226_v19  ;;  %v230_v31 = vld [vmem:[%s1509_s24 + $0x2] sm:$0xff]  ;;  %v231_v32 = vld [vmem:[%s1509_s24 + $0xa] sm:$0xff]  ;;  %v1390_v53 = vld [vmem:[%s1693_s3 + $0x38] sm:$0xff]  }
  0x14   : > { %1243 = vmatpush3.bf16.msra.mxu1 %v1354_v8  ;;  %1224 = vmatprep.subr.bf16.mxu0 %v1407_v1  ;;  %v445_v33 = vpack.c.bf16 %v231_v32, %v230_v31  ;;  %v569_v46 = vld [vmem:[#allocation2 + $0x4] sm:$0x8]  ;;  %v575_v49 = vld [vmem:[#allocation2 + $0x10] sm:$0x1]  ;;  %v1386_v51 = vld [vmem:[%s1693_s3 + $0x28] sm:$0xff]  }
  0x15   : > { %1244 = vmatprep.subr.bf16.mxu1 %v1407_v1  ;;  %v570_v47 = vsel %vm568_vm3, 0, %v569_v46  ;;  %v1384_v48 = vld [vmem:[%s1693_s3 + $0x20] sm:$0xff]   ;;  %v576_v50 = vsel %vm574_vm6, 0, %v575_v49  ;;  %v1388_v52 = vld [vmem:[%s1693_s3 + $0x30] sm:$0xff]  }
  0x16   : > { %571 = vst [vmem:[#allocation2 + $0x4] sm:$0x8] %v570_v47  ;;  %577 = vst [vmem:[#allocation2 + $0x10] sm:$0x1] %v576_v50  ;;  %v1087_v2 = vld [vmem:[%s1692_s2] ss:$0 sm:$0xff] }
  0x17   : > { %1225 = vmatpush3.bf16.msra.mxu0 %v1355_v9  ;;  %v1391_v32 = vld [vmem:[%s1693_s3 + $0xa0] sm:$0xff]  }
  0x18   : > { %1245 = vmatpush3.bf16.msra.mxu1 %v1356_v10  ;;  %1226 = vmatprep.subr.bf16.mxu0 %v1407_v1 }
  0x19   : > { %1246 = vmatprep.subr.bf16.mxu1 %v1407_v1 }
  0x1b   : > { %1227 = vmatpush3.bf16.msra.mxu0 %v1357_v11 }
  0x1c   : > { %1247 = vmatpush3.bf16.msra.mxu1 %v1358_v12  ;;  %1228 = vmatprep.subr.bf16.mxu0 %v1407_v1  ;;  %v1383_v12 = vld [vmem:[%s1693_s3 + $0x80] sm:$0xff]  }
  0x1d   : > { %1248 = vmatprep.subr.bf16.mxu1 %v1407_v1 }
  0x1f   : > { %1229 = vmatpush3.bf16.msra.mxu0 %v1359_v13 }
  0x20   : > { %1249 = vmatpush3.bf16.msra.mxu1 %v1360_v14  ;;  %1230 = vmatprep.subr.bf16.mxu0 %v1407_v1  ;;  %v1385_v14 = vld [vmem:[%s1693_s3 + $0x88] sm:$0xff]  }
  0x21   : > { %1250 = vmatprep.subr.bf16.mxu1 %v1407_v1 }
  0x23   : > { %1231 = vmatpush3.bf16.msra.mxu0 %v1361_v15  ;;  %v1387_v15 = vld [vmem:[%s1693_s3 + $0x90] sm:$0xff]  }
  0x24   : > { %1251 = vmatpush3.bf16.msra.mxu1 %v1362_v17  ;;  %1256 = vmatprep.subr.bf16.mxu0 %v1407_v1  ;;  %v587_v17 = vld [vmem:[#allocation2 + $0x4] sm:$0x8] }
  0x25   : > { %1276 = vmatprep.subr.bf16.mxu1 %v1407_v1 }
  0x26   : > { %1233 = vmatmul.mubr.bf16.vlgmr.msra.gmra.mrb[0].mxu0 %v249_v22 }
  0x27   : > { %1253 = vmatmul.mubr.bf16.vlgmr.msra.gmra.mrb[0].mxu1 %v232_v23  ;;  %1257 = vmatpush3.bf16.msra.mxu0 %v1363_v21  ;;  %v1389_v23 = vld [vmem:[%s1693_s3 + $0x98] sm:$0xff]  }
  0x28   : > { %1258 = vmatprep.subr.bf16.mxu0 %v1407_v1  ;;  %1272 = vmatprep.mubr.msk.bf16.mxu0 %vm1408_vm0, %v1407_v1 }
  0x29   : > { %1292 = vmatprep.mubr.msk.bf16.mxu1 %vm1408_vm0, %v1407_v1  ;;  %1277 = vmatpush3.bf16.msra.mxu1 %v1371_v34 }
  0x2a   : > { %1278 = vmatprep.subr.bf16.mxu1 %v1407_v1 }
  0x2b   : > { %1259 = vmatpush3.bf16.msra.mxu0 %v1364_v24 }
  0x2c   : > { %1260 = vmatprep.subr.bf16.mxu0 %v1407_v1 }
  0x2d   : > { %1279 = vmatpush3.bf16.msra.mxu1 %v1372_v36 }
  0x2e   : > { %1280 = vmatprep.subr.bf16.mxu1 %v1407_v1 }
  0x2f   : > { %1261 = vmatpush3.bf16.msra.mxu0 %v1365_v25 }
  0x30   : > { %1262 = vmatprep.subr.bf16.mxu0 %v1407_v1 }
  0x31   : > { %1281 = vmatpush3.bf16.msra.mxu1 %v1373_v37  ;;  %v1394_v37 = vld [vmem:[%s1693_s3 + $0xa8] sm:$0xff]  }
  0x32   : > { %1282 = vmatprep.subr.bf16.mxu1 %v1407_v1 }
  0x33   : > { %1263 = vmatpush3.bf16.msra.mxu0 %v1366_v26 }
  0x34   : > { %1264 = vmatprep.subr.bf16.mxu0 %v1407_v1 }
  0x35   : > { %1283 = vmatpush3.bf16.msra.mxu1 %v1374_v38  ;;  %v1398_v38 = vld [vmem:[#allocation2 + $0x10] ss:$0 sps:$4 sm:$0x11]  }
  0x36   : > { %1284 = vmatprep.subr.bf16.mxu1 %v1407_v1 }
  0x37   : > { %1265 = vmatpush3.bf16.msra.mxu0 %v1367_v27 }
  0x38   : > { %1266 = vmatprep.subr.bf16.mxu0 %v1407_v1 }
  0x39   : > { %1285 = vmatpush3.bf16.msra.mxu1 %v1375_v39 }
  0x3a   : > { %1286 = vmatprep.subr.bf16.mxu1 %v1407_v1 }
  0x3b   : > { %1267 = vmatpush3.bf16.msra.mxu0 %v1368_v28 }
  0x3c   : > { %1268 = vmatprep.subr.bf16.mxu0 %v1407_v1 }
  0x3d   : > { %1287 = vmatpush3.bf16.msra.mxu1 %v1377_v40  ;;  %v1395_v40 = vld [vmem:[%s1693_s3 + $0xb0] sm:$0xff]  }
  0x3e   : > { %1288 = vmatprep.subr.bf16.mxu1 %v1407_v1 }
  0x3f   : > { %1269 = vmatpush3.bf16.msra.mxu0 %v1369_v29 }
  0x40   : > { %1270 = vmatprep.subr.bf16.mxu0 %v1407_v1 }
  0x41   : > { %1289 = vmatpush3.bf16.msra.mxu1 %v1379_v42  ;;  %v859_v42 = vshll.u32 %v1398_v38, 16 }
  0x42   : > { %1290 = vmatprep.subr.bf16.mxu1 %v1407_v1 }
  0x43   : > { %1271 = vmatpush3.bf16.msra.mxu0 %v1370_v30  ;;  %v861_v46 = vrot.slane %v859_v42, 1 }
  0x44   : > { %1296 = vmatprep.subr.bf16.mxu0 %v1407_v1 }
  0x45   : > { %1291 = vmatpush3.bf16.msra.mxu1 %v1381_v44 }
  0x46   : > { %1273 = vmatmul.mubr.bf16.vlgmr.msra.gmra.mrb[4].mxu0 %v445_v33  ;;  %1316 = vmatprep.subr.bf16.mxu1 %v1407_v1 }
  0x47   : > { %1312 = vmatprep.mubr.msk.bf16.mxu0 %vm1408_vm0, %v1407_v1  ;;  %1297 = vmatpush3.bf16.msra.mxu0 %v1376_v35 }
  0x48   : > { %1298 = vmatprep.subr.bf16.mxu0 %v1407_v1 }
  0x4b   : > { %1299 = vmatpush3.bf16.msra.mxu0 %v1378_v41 }
  0x4c   : > { %1300 = vmatprep.subr.bf16.mxu0 %v1407_v1 }
  0x4f   : > { %1301 = vmatpush3.bf16.msra.mxu0 %v1380_v43  ;;  %v1396_v43 = vld [vmem:[%s1693_s3 + $0xb8] sm:$0xff]  }
  0x50   : > { %1302 = vmatprep.subr.bf16.mxu0 %v1407_v1 }
  0x53   : > { %1303 = vmatpush3.bf16.msra.mxu0 %v1382_v45 }
  0x54   : > { %1304 = vmatprep.subr.bf16.mxu0 %v1407_v1 }
  0x57   : > { %1305 = vmatpush3.bf16.msra.mxu0 %v1384_v48 }
  0x58   : > { %1306 = vmatprep.subr.bf16.mxu0 %v1407_v1 }
  0x5b   : > { %1307 = vmatpush3.bf16.msra.mxu0 %v1386_v51 }
  0x5c   : > { %1308 = vmatprep.subr.bf16.mxu0 %v1407_v1 }
  0x5f   : > { %1309 = vmatpush3.bf16.msra.mxu0 %v1388_v52 }
  0x60   : > { %1310 = vmatprep.subr.bf16.mxu0 %v1407_v1 }
  0x63   : > { %1311 = vmatpush3.bf16.msra.mxu0 %v1390_v53 }
  0xf9   : > { %v349_v54 = vpop.f32.mrb[0].mxu0 }
  0xfa   : > { %v438_v55 = vpop.f32.mrb[0].mxu1  ;;  %v1234_v56 = vpop.f32.mrb[1].mxu0 }
  0xfb   : > { %v439_v57 = vadd.f32 %v438_v55, %v349_v54  ;;  %v1254_v58 = vpop.f32.mrb[1].mxu1  ;;  %v352_v59 = vpop.f32.mrb[2].mxu0 }
  0xfc   : > { %v441_v60 = vpop.f32.mrb[2].mxu1  ;;  %v1235_v61 = vpop.f32.mrb[3].mxu0 }
  0xfd   : > { %v442_v62 = vadd.f32 %v441_v60, %v352_v59  ;;  %v1255_v63 = vpop.f32.mrb[3].mxu1 }
 0x119   : > { %v545_v0 = vpop.f32.mrb[4].mxu0 }
 0x11a   : > { %v552_v3 = vadd.f32 %v545_v0, %v439_v57  ;;  %v1274_v4 = vpop.f32.mrb[5].mxu0 }
 0x11b   : > { %v548_v5 = vpop.f32.mrb[6].mxu0 }
 0x11c   : > { %v561_v6 = vadd.f32 %v1087_v2, %v552_v3  ;;  %v553_v7 = vadd.f32 %v548_v5, %v442_v62  ;;  %v1275_v8 = vpop.f32.mrb[7].mxu0 }
 0x11e   : > { %v562_v9 = vadd.f32 %v1087_v2, %v553_v7  ;;  %v563_v10 = vmax.f32 %v561_v6, 0.0 }
 0x120   : > { %v564_v11 = vmax.f32 %v562_v9, 0.0 }
 0x122   : > { %v565_v13 = vpack.c.bf16 %v564_v11, %v563_v10 }
 0x124   : > { %1161 = vst [vmem:[#allocation2 + $0x8] sm:$0xff] %v565_v13   ;;  %1293 = vmatmul.mubr.bf16.vlgmr.msra.gmra.mrb[4].mxu1 %v565_v13 }
 0x125   : > { %1317 = vmatpush3.bf16.msra.mxu1 %v1383_v12  ;;  %1332 = vmatprep.mubr.msk.bf16.mxu1 %vm1408_vm0, %v1407_v1 }
 0x126   : > { %1318 = vmatprep.subr.bf16.mxu1 %v1407_v1 }
 0x129   : > { %1319 = vmatpush3.bf16.msra.mxu1 %v1385_v14 }
 0x12a   : > { %1320 = vmatprep.subr.bf16.mxu1 %v1407_v1 }
 0x12b   : > { %v588_v19 = vld [vmem:[#allocation2 + $0x8] sm:$0xf]  ;;  %v589_v20 = vld [vmem:[#allocation2 + $0xc] sm:$0xf] }
 0x12c   : > { %v1114_v21 = vcombine.low %v587_v17, %v588_v19  ;;  %v1115_v22 = vcombine.low %v589_v20, %v589_v20  ;;  %v1140_v35 = vcombine.low %v588_v19, %v589_v20 }
 0x12d   : > { %1321 = vmatpush3.bf16.msra.mxu1 %v1387_v15 }
 0x12e   : > { %1322 = vmatprep.subr.bf16.mxu1 %v1407_v1  ;;  %v723_v24 = vshrl.u32 %v1114_v21, 16  ;;  %v726_v25 = vshll.u32 %v1114_v21, 16  ;;  %v731_v26 = vshrl.u32 %v1115_v22, 16  ;;  %v734_v27 = vshll.u32 %v1115_v22, 16 }
 0x12f   : > { %v854_v39 = vshll.u32 %v1140_v35, 16  ;;  %v852_v44 = vshrl.u32 %v1140_v35, 16 }
 0x130   : > { %v725_v28 = vrot.slane %v723_v24, 3  ;;  %v728_v29 = vrot.slane %v726_v25, 4  ;;  %v733_v30 = vrot.slane %v731_v26, 3  ;;  %v736_v31 = vrot.slane %v734_v27, 4 }
 0x131   : > { %1323 = vmatpush3.bf16.msra.mxu1 %v1389_v23  ;;  %v856_v41 = vrot.slane %v854_v39, 1 }
 0x132   : > { %1324 = vmatprep.subr.bf16.mxu1 %v1407_v1  ;;  %v729_v33 = vor.u32 %v728_v29, %v725_v28  ;;  %v737_v34 = vor.u32 %v736_v31, %v733_v30 }
 0x133   : > { %v857_v45 = vor.u32 %v856_v41, %v852_v44 }
 0x134   : > { %v738_v36 = vsel %vm721_vm7, %v729_v33, %v737_v34 }
 0x135   : > { %1325 = vmatpush3.bf16.msra.mxu1 %v1391_v32  ;;  %1313 = vmatmul.mubr.bf16.vlgmr.msra.gmra.mrb[8].mxu0 %v738_v36  ;;  %v862_v47 = vsel %vm850_vm8, %v857_v45, %v861_v46 }
 0x136   : > { %1326 = vmatprep.subr.bf16.mxu1 %v1407_v1 }
 0x139   : > { %1327 = vmatpush3.bf16.msra.mxu1 %v1394_v37 }
 0x13a   : > { %1328 = vmatprep.subr.bf16.mxu1 %v1407_v1 }
 0x13d   : > { %1329 = vmatpush3.bf16.msra.mxu1 %v1395_v40 }
 0x13e   : > { %1330 = vmatprep.subr.bf16.mxu1 %v1407_v1  ;;  %v1150_v1 = vld [vmem:[%s1694_s4] ss:$0 sm:$0xff] }
 0x141   : > { %1331 = vmatpush3.bf16.msra.mxu1 %v1396_v43 }
 0x144   : > { %1333 = vmatmul.mubr.bf16.vlgmr.msra.gmra.mrb[8].mxu1 %v862_v47 }
 0x1f7   : > { %v706_v48 = vpop.f32.mrb[4].mxu1 }
 0x1f8   : > { %v1294_v49 = vpop.f32.mrb[5].mxu1 }
 0x1f9   : > { %v709_v50 = vpop.f32.mrb[6].mxu1 }
 0x1fa   : > { %v1295_v51 = vpop.f32.mrb[7].mxu1 }
 0x208   : > { %v822_v52 = vpop.f32.mrb[8].mxu0 }
 0x209   : > { %v823_v53 = vadd.f32 %v822_v52, %v706_v48  ;;  %v1314_v54 = vpop.f32.mrb[9].mxu0 }
 0x20a   : > { %v825_v55 = vpop.f32.mrb[10].mxu0 }
 0x20b   : > { %v826_v56 = vadd.f32 %v825_v55, %v709_v50  ;;  %v1315_v57 = vpop.f32.mrb[11].mxu0 }
 0x217   : > { %v946_v58 = vpop.f32.mrb[8].mxu1 }
 0x218   : > { %v953_v59 = vadd.f32 %v946_v58, %v823_v53  ;;  %v1334_v60 = vpop.f32.mrb[9].mxu1 }
 0x219   : > { %v949_v61 = vpop.f32.mrb[10].mxu1 }
 0x21a   : > { %v962_v62 = vadd.f32 %v1150_v1, %v953_v59  ;;  %v954_v63 = vadd.f32 %v949_v61, %v826_v56  ;;  %v1335_v0 = vpop.f32.mrb[11].mxu1 }
 0x21c   : > { %v964_v2 = vadd.f32 %v962_v62, %v1523_v16  ;;  %v963_v3 = vadd.f32 %v1150_v1, %v954_v63 }
 0x21e   : > { %966 = vst [vmem:[%s224_s10] sm:$0xff] %v964_v2  ;;  %v965_v4 = vadd.f32 %v963_v3, %v1529_v18 }
 0x220   : > { %967 = vst [vmem:[%s224_s10 + $0x8] sm:$0xff] %v965_v4 }
 0x221 PF: > { %s15_s18 = sadd.s32 1, %s1405_s18  }
 0x222   : > { %p12_p4 = scmp.ge.s32.totalorder %s15_s18, 4  }
 0x224   :  { %14 = sbr.rel (!%p12_p4) target bundleno = 1 (0x1), region = 74 }

</bundles_post_ra>
